<compile_context>
chip_gen: v7x
topology: tpu7x:2x2x1
jax: 0.10.0
libtpu: 0.0.40
codegen_flags: <defaults>
</compile_context>

<pallas_src>
import functools

import jax
import jax.numpy as jnp
from jax.experimental import pallas as pl
from jax.experimental.pallas import tpu as pltpu


def _focal_loss_kernel(logit_ref, target_ref, out_ref, *, gamma):
    x = logit_ref[...].astype(jnp.float32)
    t = target_ref[...].astype(jnp.float32)

    # Shared softplus term. For binary targets (t in {0,1}) we have |z| == |x|
    # where z = -x*(2t-1), so one log1p(exp(-|x|)) serves both the BCE term and
    # logsigmoid(z). Total EUP ops per element: exp, log1p, exp  (3 vs 6 before).
    sp = jnp.log1p(jnp.exp(-jnp.abs(x)))          # log(1 + exp(-|x|))

    # BCE-with-logits, numerically stable:
    #   x - x*t + max(-x, 0) + log1p(exp(-|x|))
    bce = x - x * t + jnp.maximum(-x, 0.0) + sp

    # invprobs = logsigmoid(z) = min(z, 0) - log1p(exp(-|z|)),  z = -x*(2t-1)
    z = x * (1.0 - 2.0 * t)
    invprobs = jnp.minimum(z, 0.0) - sp

    out_ref[...] = jnp.exp(invprobs * gamma) * bce


def focal_loss2(logit, target, gamma=2.0, *, row_tile=2048, lanes=128):
    """Elementwise focal loss (no reduction). Returns f32 array of logit.shape."""
    assert logit.shape == target.shape
    orig_shape = logit.shape
    total = logit.size

    # Minimal padding: only up to a multiple of 8*128 so the (8,128) tiling holds,
    # and skipped entirely when the flat size already divides (the common case).
    pad_unit = 8 * lanes
    padded = ((total + pad_unit - 1) // pad_unit) * pad_unit

    x = jnp.ravel(logit)    # keep native dtype; cast per-tile inside the kernel
    t = jnp.ravel(target)
    if padded != total:
        x = jnp.pad(x, (0, padded - total))
        t = jnp.pad(t, (0, padded - total))

    rows = padded // lanes
    x2 = x.reshape(rows, lanes)
    t2 = t.reshape(rows, lanes)

    # rows is a multiple of 8 by construction; clamp the block to the array so
    # small inputs still satisfy the (8,128) / full-dim constraint.
    row_block = min(row_tile, rows)
    grid = (pl.cdiv(rows, row_block),)

    kernel = functools.partial(_focal_loss_kernel, gamma=float(gamma))

    out2 = pl.pallas_call(
        kernel,
        out_shape=jax.ShapeDtypeStruct((rows, lanes), jnp.float32),
        grid_spec=pltpu.PrefetchScalarGridSpec(
            num_scalar_prefetch=0,
            grid=grid,
            in_specs=[
                pl.BlockSpec((row_block, lanes), lambda i: (i, 0)),
                pl.BlockSpec((row_block, lanes), lambda i: (i, 0)),
            ],
            out_specs=pl.BlockSpec((row_block, lanes), lambda i: (i, 0)),
        ),
        compiler_params=pltpu.CompilerParams(
            dimension_semantics=("parallel",),
        ),
    )(x2, t2)

    out = out2.reshape(-1)
    if padded != total:
        out = out[:total]
    return out.reshape(orig_shape)


def focal_loss2_ref(logit, target, gamma=2.0):
    """Pure-JAX reference mirroring the PyTorch forward."""
    x = logit.astype(jnp.float32)
    t = target.astype(jnp.float32)
    max_val = jnp.maximum(-x, 0.0)
    loss = x - x * t + max_val + jnp.log(jnp.exp(-max_val) + jnp.exp(-x - max_val))
    invprobs = jax.nn.log_sigmoid(-x * (t * 2.0 - 1.0))
    return jnp.exp(invprobs * gamma) * loss


if __name__ == "__main__":
    key = jax.random.PRNGKey(0)
    k1, k2 = jax.random.split(key)

    # NCHW: batch=2, channels=4, spatial=16x16 (per-pixel binary logits / targets)
    B, C, H, W = 2, 4, 16, 16
    logit = jax.random.normal(k1, (B, C, H, W), dtype=jnp.float32) * 3.0
    target = (jax.random.uniform(k2, (B, C, H, W)) > 0.5).astype(jnp.float32)

    out = focal_loss2(logit, target, gamma=2.0)
    out = jax.block_until_ready(out)

    ref = focal_loss2_ref(logit, target, gamma=2.0)
    assert out.shape == (B, C, H, W)
    assert jnp.allclose(out, ref, atol=1e-5, rtol=1e-5), "mismatch vs reference"

    print("KERNEL_OK")
</pallas_src>

<mosaic_0001>
module attributes {stable_mosaic.version = 11 : i64} {
  func.func @_focal_loss_kernel(%arg0: i32, %arg1: memref<16x128xf32, #tpu.memory_space<vmem>>, %arg2: memref<16x128xf32, #tpu.memory_space<vmem>>, %arg3: memref<16x128xf32, #tpu.memory_space<vmem>>) attributes {dimension_semantics = [#tpu.dimension_semantics<parallel>], iteration_bounds = array<i64: 1>, scalar_prefetch = 0 : i64, scratch_operands = 0 : i64, tpu.core_type = #tpu.core_type<tc>, window_params = [{transform_indices = @transform_0, window_bounds = array<i64: 16, 128>}, {transform_indices = @transform_1, window_bounds = array<i64: 16, 128>}, {transform_indices = @transform_2, window_bounds = array<i64: 16, 128>}]} {
    %c0 = arith.constant 0 : index
    %c0_0 = arith.constant 0 : index
    %0 = vector.load %arg1[%c0, %c0_0] : memref<16x128xf32, #tpu.memory_space<vmem>>, vector<16x128xf32>
    %c0_1 = arith.constant 0 : index
    %c0_2 = arith.constant 0 : index
    %1 = vector.load %arg2[%c0_1, %c0_2] : memref<16x128xf32, #tpu.memory_space<vmem>>, vector<16x128xf32>
    %2 = math.absf %0 : vector<16x128xf32>
    %cst = arith.constant 0.000000e+00 : f32
    %3 = vector.broadcast %cst : f32 to vector<16x128xf32>
    %4 = arith.subf %3, %2 : vector<16x128xf32>
    %5 = math.exp %4 : vector<16x128xf32>
    %6 = math.log1p %5 : vector<16x128xf32>
    %7 = arith.mulf %0, %1 : vector<16x128xf32>
    %8 = arith.subf %0, %7 : vector<16x128xf32>
    %cst_3 = arith.constant 0.000000e+00 : f32
    %9 = vector.broadcast %cst_3 : f32 to vector<16x128xf32>
    %10 = arith.subf %9, %0 : vector<16x128xf32>
    %cst_4 = arith.constant 0.000000e+00 : f32
    %11 = vector.broadcast %cst_4 : f32 to vector<16x128xf32>
    %12 = arith.maximumf %10, %11 : vector<16x128xf32>
    %13 = arith.addf %8, %12 : vector<16x128xf32>
    %14 = arith.addf %13, %6 : vector<16x128xf32>
    %cst_5 = arith.constant 2.000000e+00 : f32
    %15 = vector.broadcast %cst_5 : f32 to vector<16x128xf32>
    %16 = arith.mulf %15, %1 : vector<16x128xf32>
    %cst_6 = arith.constant 1.000000e+00 : f32
    %17 = vector.broadcast %cst_6 : f32 to vector<16x128xf32>
    %18 = arith.subf %17, %16 : vector<16x128xf32>
    %19 = arith.mulf %0, %18 : vector<16x128xf32>
    %cst_7 = arith.constant 0.000000e+00 : f32
    %20 = vector.broadcast %cst_7 : f32 to vector<16x128xf32>
    %21 = arith.minimumf %19, %20 : vector<16x128xf32>
    %22 = arith.subf %21, %6 : vector<16x128xf32>
    %cst_8 = arith.constant 2.000000e+00 : f32
    %23 = vector.broadcast %cst_8 : f32 to vector<16x128xf32>
    %24 = arith.mulf %22, %23 : vector<16x128xf32>
    %25 = math.exp %24 : vector<16x128xf32>
    %26 = arith.mulf %25, %14 : vector<16x128xf32>
    %c0_9 = arith.constant 0 : index
    %c0_10 = arith.constant 0 : index
    %27 = vector.load %arg3[%c0_9, %c0_10] : memref<16x128xf32, #tpu.memory_space<vmem>>, vector<16x128xf32>
    tpu.vector_store %arg3[%c0_9, %c0_10], %26 {strides = array<i32>} : memref<16x128xf32, #tpu.memory_space<vmem>>, vector<16x128xf32>,
    return
  }
  func.func @transform_0(%arg0: i32) -> (i32, i32) {
    %c0_i32 = arith.constant 0 : i32
    %c0_i32_0 = arith.constant 0 : i32
    return %arg0, %c0_i32 : i32, i32
  }
  func.func @transform_1(%arg0: i32) -> (i32, i32) {
    %c0_i32 = arith.constant 0 : i32
    %c0_i32_0 = arith.constant 0 : i32
    return %arg0, %c0_i32 : i32, i32
  }
  func.func @transform_2(%arg0: i32) -> (i32, i32) {
    %c0_i32 = arith.constant 0 : i32
    %c0_i32_0 = arith.constant 0 : i32
    return %arg0, %c0_i32 : i32, i32
  }
}

</mosaic_0001>

<bundles_post_ra>
// kernel: tpu_custom_call.1
= control target key start
LH: loop header
LB: loop body
LE: loop exit
PB: predicated region body
PF: predicated region fallthrough
CT: control target
= control target key end

     0   :  { %7 = vsyncpa [#allocation3], 0  ;;  %s274_s0 = inlined_call_operand.hbm [shape: f32[16,128], index: 0, kind: input, shape index: {}]   ;;  %s275_s1 = inlined_call_operand.hbm [shape: f32[16,128], index: 1, kind: input, shape index: {}]   ;;  %s276_s2 = inlined_call_operand.hbm [shape: f32[16,128], index: 2, kind: output, shape index: {}]  }
   0x1   :  { %8 = vsyncpa [#allocation6], 0 }
   0x2   :  { %9 = vsyncpa [#allocation4], 0  ;;  %s209_s9 = smov [#allocation2]   ;;  %s137_s13 = scalar_lea.hbm %s274_s0, 256 }
   0x3   :  { %s15_s10 = sshll.u32 %s209_s9, 4  ;;  %p138_p0 = scmp.ne.s32.totalorder %s274_s0, %s137_s13  ;;  %s16_s10 = int_to_ptr.vmem [resolvable:$true] %s15_s10 }
   0x4   :  { %p141_p1 = scmp.lt.u32.totalorder %s137_s13, %s274_s0 }
   0x6   :  { %p143_p2 = pnand %p141_p1, %p138_p0 }
   0x8   :  { %146 = shalt.err (!%p143_p2)
}
   0x9   :  { %s147_s18 = scalar_lea.vmem %s16_s10, 256  ;;  %p152_p4 = scmp.lt.s32.totalorder %s16_s10, %s16_s10 }
   0xa   :  { %p148_p3 = scmp.ne.s32.totalorder %s16_s10, %s147_s18  ;;  %p153_p5 = scmp.lt.s32.totalorder %s147_s18, %s147_s18 }
   0xc   :  { %p154_p6 = por %p153_p5, %p152_p4 }
   0xe   :  { %p155_p7 = pnand %p154_p6, %p148_p3 }
  0x10   :  { %158 = shalt.err (!%p155_p7)
}
  0x11   :  { %s210_s19 = smov 128   ;;  %s211_s20 = smov 8  }
  0x12   :  { %21 = dma.hbm_to_vmem [thread:$0]  %s274_s0, 256, %s16_s10, [#allocation3], %s210_s19, %s210_s19, %s211_s20  }
  0x13   :  { %s212_s23 = smov [#allocation5]   ;;  %s159_s27 = scalar_lea.hbm %s275_s1, 256 }
  0x14   :  { %s27_s24 = sshll.u32 %s212_s23, 4  ;;  %p160_p8 = scmp.ne.s32.totalorder %s275_s1, %s159_s27  ;;  %s28_s24 = int_to_ptr.vmem [resolvable:$true] %s27_s24 }
  0x15   :  { %p163_p9 = scmp.lt.u32.totalorder %s159_s27, %s275_s1 }
  0x17   :  { %p165_p10 = pnand %p163_p9, %p160_p8 }
  0x19   :  { %168 = shalt.err (!%p165_p10)
}
  0x1a   :  { %s169_s4 = scalar_lea.vmem %s28_s24, 256  ;;  %p174_p12 = scmp.lt.s32.totalorder %s28_s24, %s28_s24 }
  0x1b   :  { %p170_p11 = scmp.ne.s32.totalorder %s28_s24, %s169_s4  ;;  %p175_p13 = scmp.lt.s32.totalorder %s169_s4, %s169_s4 }
  0x1d   :  { %p176_p0 = por %p175_p13, %p174_p12 }
  0x1f   :  { %p177_p1 = pnand %p176_p0, %p170_p11 }
  0x21   :  { %180 = shalt.err (!%p177_p1)
}
  0x22   :  { %33 = dma.hbm_to_vmem [thread:$0]  %s275_s1, 256, %s28_s24, [#allocation6], %s210_s19, %s210_s19, %s211_s20  }
  0x23   :  { %203 = dma.done.wait [#allocation3], 256  }
  0x24   :  { %204 = vsyncadd [#allocation3], 4294967040 }
  0x25   :  { %205 = dma.done.wait [#allocation6], 256  }
  0x26   :  { %206 = vsyncadd [#allocation6], 4294967040  ;;  %v40_v0 = vld [vmem:[#allocation2] sm:$0xff]  ;;  %v41_v1 = vld [vmem:[#allocation2 + $0x8] sm:$0xff]  ;;  %s213_s1 = smov [#allocation7]  }
  0x27   :  { %v44_v2 = vand.u32 2147483647, %v40_v0  ;;  %v45_v3 = vand.u32 2147483647, %v41_v1  ;;  %v42_v8 = vld [vmem:[#allocation5] sm:$0xff]  ;;  %v43_v9 = vld [vmem:[#allocation5 + $0x8] sm:$0xff] }
  0x28   :  { %v82_v13 = vmul.f32 2.0, %v42_v8  ;;  %v83_v15 = vmul.f32 2.0, %v43_v9  ;;  %v70_v37 = vmul.f32 %v42_v8, %v40_v0  ;;  %v74_v38 = vsub.f32 0.0, %v40_v0  ;;  %s107_s6 = sshll.u32 %s213_s1, 4  ;;  %s108_s6 = int_to_ptr.vmem [resolvable:$true] %s107_s6 }
  0x29   :  { %v46_v4 = vsub.f32 0.0, %v44_v2  ;;  %v47_v5 = vsub.f32 0.0, %v45_v3  ;;  %v71_v41 = vmul.f32 %v43_v9, %v41_v1  ;;  %v75_v42 = vsub.f32 0.0, %v41_v1  ;;  %s181_s7 = scalar_lea.vmem %s108_s6, 256  ;;  %p186_p3 = scmp.lt.s32.totalorder %s108_s6, %s108_s6 }
  0x2a   :  { %v84_v17 = vsub.f32 1.0, %v82_v13  ;;  %v85_v19 = vsub.f32 1.0, %v83_v15  ;;  %v72_v45 = vsub.f32 %v40_v0, %v70_v37  ;;  %v76_v46 = vmax.f32 %v74_v38, 0.0  ;;  %p182_p2 = scmp.ne.s32.totalorder %s108_s6, %s181_s7  ;;  %p187_p4 = scmp.lt.s32.totalorder %s181_s7, %s181_s7 }
  0x2b   :  { %v48_v6 = vmul.f32 1.442695, %v46_v4  ;;  %v50_v7 = vmul.f32 1.442695, %v47_v5  ;;  %v73_v48 = vsub.f32 %v41_v1, %v71_v41  ;;  %v77_v49 = vmax.f32 %v75_v42, 0.0 }
  0x2c   :  { %v86_v22 = vmul.f32 %v84_v17, %v40_v0  ;;  %v87_v25 = vmul.f32 %v85_v19, %v41_v1  ;;  %v78_v50 = vadd.f32 %v76_v46, %v72_v45  ;;  %p188_p5 = por %p187_p4, %p186_p3 }
  0x2d   :  { %125 = vpow2.f32 %v48_v6  ;;  %v79_v51 = vadd.f32 %v77_v49, %v73_v48 }
  0x2e   :  { %127 = vpow2.f32 %v50_v7  ;;  %v88_v28 = vmin.f32 %v86_v22, 0.0  ;;  %v89_v32 = vmin.f32 %v87_v25, 0.0  ;;  %p189_p6 = pnand %p188_p5, %p182_p2 }
  0x37   :  { %v126_v10 = vpop.eup %125 }
  0x38   :  { %v128_v11 = vpop.eup %127  ;;  %v52_v12 = vadd.f32 1.0, %v126_v10  ;;  %v55_v16 = vmul.f32 -0.5, %v126_v10  ;;  %v58_v21 = vand.u32 2147483647, %v126_v10 }
  0x39   :  { %v61_v14 = vadd.f32 1.0, %v128_v11  ;;  %v64_v18 = vmul.f32 -0.5, %v128_v11  ;;  %v67_v24 = vand.u32 2147483647, %v128_v11 }
  0x3a   :  { %129 = vlog2.f32 %v52_v12  ;;  %v56_v20 = vadd.f32 1.0, %v55_v16  ;;  %vm59_vm0 = vcmp.lt.f32.partialorder %v58_v21, 0.0004427343 }
  0x3b   :  { %131 = vlog2.f32 %v61_v14  ;;  %v65_v23 = vadd.f32 1.0, %v64_v18  ;;  %vm68_vm1 = vcmp.lt.f32.partialorder %v67_v24, 0.0004427343 }
  0x3c   :  { %v57_v26 = vmul.f32 %v126_v10, %v56_v20 }
  0x3d   :  { %v66_v29 = vmul.f32 %v128_v11, %v65_v23 }
  0x44   :  { %v130_v27 = vpop.eup %129 }
  0x45   :  { %v132_v30 = vpop.eup %131  ;;  %v54_v31 = vmul.f32 0.6931472, %v130_v27 }
  0x46   :  { %v63_v33 = vmul.f32 0.6931472, %v132_v30 }
  0x47   :  { %v60_v34 = vsel %vm59_vm0, %v57_v26, %v54_v31 }
  0x48   :  { %v90_v35 = vsub.f32 %v88_v28, %v60_v34  ;;  %v69_v36 = vsel %vm68_vm1, %v66_v29, %v63_v33  ;;  %v80_v52 = vadd.f32 %v78_v50, %v60_v34 }
  0x49   :  { %v91_v39 = vsub.f32 %v89_v32, %v69_v36  ;;  %v81_v53 = vadd.f32 %v79_v51, %v69_v36 }
  0x4a   :  { %v92_v40 = vmul.f32 2.0, %v90_v35 }
  0x4b   :  { %v93_v43 = vmul.f32 2.0, %v91_v39 }
  0x4c   :  { %v94_v44 = vmul.f32 1.442695, %v92_v40 }
  0x4d   :  { %v96_v47 = vmul.f32 1.442695, %v93_v43 }
  0x4e   :  { %133 = vpow2.f32 %v94_v44 }
  0x4f   :  { %135 = vpow2.f32 %v96_v47 }
  0x58   :  { %v134_v54 = vpop.eup %133 }
  0x59   :  { %v136_v55 = vpop.eup %135  ;;  %v98_v56 = vmul.f32 %v134_v54, %v80_v52 }
  0x5a   :  { %v99_v57 = vmul.f32 %v136_v55, %v81_v53 }
  0x5b   :  { %100 = vst [vmem:[#allocation7] sm:$0xff] %v98_v56 }
  0x5c   :  { %101 = vst [vmem:[#allocation7 + $0x8] sm:$0xff] %v99_v57 }
  0x5d   :  { %192 = shalt.err (!%p189_p6)
}
  0x5e   :  { %s193_s10 = scalar_lea.hbm %s276_s2, 256 }
  0x5f   :  { %p194_p7 = scmp.ne.s32.totalorder %s276_s2, %s193_s10  ;;  %p197_p8 = scmp.lt.u32.totalorder %s193_s10, %s276_s2 }
  0x61   :  { %p199_p9 = pnand %p197_p8, %p194_p7 }
  0x63   :  { %202 = shalt.err (!%p199_p9)
}
  0x64   :  { %113 = dma.vmem_to_hbm [thread:$0]  %s108_s6, 256, %s276_s2, [#allocation4], %s210_s19, %s210_s19, %s211_s20  }
  0x65   :  { %207 = dma.done.wait [#allocation4], 256  }
  0x66   :  { %208 = vsyncadd [#allocation4], 4294967040 }
  0x67   :  { %117 = vsyncpa [#allocation3], 1 }
  0x68   :  { %118 = vsyncpa [#allocation6], 1 }
  0x69   :  { %119 = vsyncpa [#allocation4], 1 }

</bundles_post_ra>
